<compile_context>
chip_gen: v6e
topology: v6e:2x2x1
jax: 0.10.0
libtpu: 0.0.40
codegen_flags: <defaults>
</compile_context>

<pallas_src>
import functools

import jax
import jax.numpy as jnp
import numpy as np
from jax import lax
from jax.experimental import pallas as pl
from jax.experimental.pallas import tpu as pltpu


def _shuffle_attention_kernel(p_ref, x_ref, o_ref, *, eps):
    """One grid step: Nb batch elements x Cb channel rows x (H*W) lanes.

    p_ref : VMEM f32 (3, Cb, 1)   folded per-row params [A, B, E]
    x_ref : VMEM (Nb, Cb, HW)     input rows (pre-shuffle channel order)
    o_ref : VMEM (Nb, Cb, HW)     gated output rows (shuffle fused via out_spec)
    """
    x = x_ref[...]                                   # (Nb, Cb, HW)
    xf = x.astype(jnp.float32)

    A = p_ref[0]                                     # (Cb, 1)
    B = p_ref[1]
    E = p_ref[2]

    # Per-row spatial statistics over H*W (mean and biased variance).
    mu = jnp.mean(xf, axis=-1, keepdims=True)        # (Nb, Cb, 1)
    xc = xf - mu
    var = jnp.mean(xc * xc, axis=-1, keepdims=True)  # (Nb, Cb, 1)
    rstd = lax.rsqrt(var + eps)                      # EUP

    # Unified gating argument: channel rows have E=0, spatial rows have B=0.
    arg = (E * rstd) * xc + (B * mu + A)             # (Nb, Cb, HW)
    scale = jax.nn.sigmoid(arg)                      # EUP exp + VPU

    o_ref[...] = (xf * scale).astype(o_ref.dtype)


def _pick_channel_block(C2, row_bytes, budget):
    """Largest multiple-of-8 divisor of C2 whose tile fits the budget."""
    max_rows = budget // max(row_bytes, 1)
    if C2 <= max_rows:
        return C2
    best = 8
    for cand in range(8, C2, 8):
        if C2 % cand == 0 and cand <= max_rows:
            best = cand
    return best


def shuffle_attention(x, cweight, cbias, sweight, sbias, gn_weight, gn_bias,
                      *, G, eps=1e-5):
    """ShuffleAttention forward. x: (N, C, H, W); params have C // (2*G) channels."""
    N, C, H, W = x.shape
    assert C % (2 * G) == 0
    Cg = C // G            # channels per shuffle group
    Cg2 = Cg // 2          # channels per branch
    C2 = C // 2            # pre-shuffle rows in one "half"
    HW = H * W

    # Tiling assumptions (second-minor / lane dims of the blocks).
    assert C2 % 8 == 0 and HW % 128 == 0, "assumes (8,128)-tileable blocks"

    f32 = jnp.float32
    cw = jnp.reshape(cweight, (Cg2,)).astype(f32)
    cb = jnp.reshape(cbias, (Cg2,)).astype(f32)
    sw = jnp.reshape(sweight, (Cg2,)).astype(f32)
    sb = jnp.reshape(sbias, (Cg2,)).astype(f32)
    ga = jnp.reshape(gn_weight, (Cg2,)).astype(f32)
    be = jnp.reshape(gn_bias, (Cg2,)).astype(f32)

    # Fold all parameters into per-row [A, B, E] over ALL C pre-shuffle channels
    # (pattern period Cg; valid for any G):
    #   channel rows (k%Cg <  Cg2): arg = cw*mu + cb               -> A=cb,        B=cw, E=0
    #   spatial rows (k%Cg >= Cg2): arg = sw*(ga*(x-mu)*rstd+be)+sb
    #                                   = (sw*ga)*rstd*(x-mu) + (sb+sw*be)
    #                                                             -> A=sb+sw*be, B=0,  E=sw*ga
    j = jnp.arange(C) % Cg
    is_ch = j < Cg2
    jj = jnp.where(is_ch, j, j - Cg2)
    A = jnp.where(is_ch, cb[jj], sb[jj] + sw[jj] * be[jj])
    B = jnp.where(is_ch, cw[jj], 0.0)
    E = jnp.where(is_ch, 0.0, sw[jj] * ga[jj])
    params = jnp.stack([A, B, E], axis=0).reshape(3, C, 1).astype(f32)

    # Lane-dense layout (free contiguous reshape).
    x3 = x.reshape(N, C, HW)

    # Tile sizing: target ~3 MiB input tiles (measured roofline knee); with
    # double-buffered in+out tiles this stays inside the default scoped VMEM
    # limit on every chip generation (v5e 16 MiB .. v7x 32 MiB).
    itemsize = jnp.dtype(x.dtype).itemsize
    budget = 3 * 1024 * 1024
    row_bytes = HW * itemsize

    Cb = _pick_channel_block(C2, row_bytes, budget)
    if Cb == C2:
        Nb = int(max(1, min(N, budget // max(Cb * row_bytes, 1))))
        while N % Nb:
            Nb -= 1
    else:
        Nb = 1

    cblocks = C2 // Cb
    grid = (N // Nb, 2, cblocks)   # (batch blocks, channel half, channel blocks)

    out = pl.pallas_call(
        functools.partial(_shuffle_attention_kernel, eps=eps),
        out_shape=jax.ShapeDtypeStruct((N, C2, 2 * HW), x.dtype),
        grid=grid,
        in_specs=[
            # folded params: rows [r*C2 + cb*Cb, ...) of the (3, C, 1) table
            pl.BlockSpec((3, Cb, 1),
                         lambda nb, r, cb: (0, r * cblocks + cb, 0)),
            # input rows of half r, channel block cb
            pl.BlockSpec((Nb, Cb, HW),
                         lambda nb, r, cb: (nb, r * cblocks + cb, 0)),
        ],
        # Half r is written to lane-block r -> the contiguous reshape below is
        # exactly channel_shuffle(cat([channel, spatial]), groups=2), for free.
        out_specs=pl.BlockSpec((Nb, Cb, HW), lambda nb, r, cb: (nb, cb, r)),
        compiler_params=pltpu.CompilerParams(
            dimension_semantics=("parallel", "parallel", "parallel")),
    )(params, x3)

    # (N, C2, 2*HW) -> (N, C, H, W): output channel = 2*(k % C2) + (k // C2).
    return out.reshape(N, C, H, W)


def _reference(x, cweight, cbias, sweight, sbias, gn_weight, gn_bias, *, G, eps=1e-5):
    b, c, h, w = x.shape
    cg2 = c // (2 * G)
    xg = x.reshape(b * G, c // G, h, w)
    x0, x1 = xg[:, :cg2], xg[:, cg2:]

    cwb = cweight.reshape(1, cg2, 1, 1)
    cbb = cbias.reshape(1, cg2, 1, 1)
    swb = sweight.reshape(1, cg2, 1, 1)
    sbb = sbias.reshape(1, cg2, 1, 1)
    gab = gn_weight.reshape(1, cg2, 1, 1)
    beb = gn_bias.reshape(1, cg2, 1, 1)

    # channel attention
    xc = jnp.mean(x0, axis=(2, 3), keepdims=True)
    xc = cwb * xc + cbb
    x_channel = x0 * jax.nn.sigmoid(xc)

    # spatial attention: GroupNorm(cg2, cg2) == per-channel norm over (h, w)
    mu = jnp.mean(x1, axis=(2, 3), keepdims=True)
    var = jnp.mean((x1 - mu) ** 2, axis=(2, 3), keepdims=True)
    xn = (x1 - mu) / jnp.sqrt(var + eps)
    xn = xn * gab + beb
    xs = swb * xn + sbb
    x_spatial = x1 * jax.nn.sigmoid(xs)

    out = jnp.concatenate([x_channel, x_spatial], axis=1)
    out = out.reshape(b, c, h, w)
    # channel shuffle, groups = 2
    out = out.reshape(b, 2, c // 2, h, w).transpose(0, 2, 1, 3, 4).reshape(b, c, h, w)
    return out


if __name__ == "__main__":
    key = jax.random.PRNGKey(0)
    kx, k1, k2, k3, k4, k5, k6 = jax.random.split(key, 7)

    N, C, H, W, G = 2, 64, 16, 16, 4
    Cg2 = C // (2 * G)

    x = jax.random.normal(kx, (N, C, H, W), dtype=jnp.float32)

    # Module defaults are cweight=0, cbias=1, sweight=0, sbias=1, gn=(1,0);
    # random values are used so every term of the forward pass is exercised.
    cweight = 0.5 * jax.random.normal(k1, (1, Cg2, 1, 1), jnp.float32)
    cbias = 1.0 + 0.5 * jax.random.normal(k2, (1, Cg2, 1, 1), jnp.float32)
    sweight = 0.5 * jax.random.normal(k3, (1, Cg2, 1, 1), jnp.float32)
    sbias = 1.0 + 0.5 * jax.random.normal(k4, (1, Cg2, 1, 1), jnp.float32)
    gn_weight = 1.0 + 0.1 * jax.random.normal(k5, (Cg2,), jnp.float32)
    gn_bias = 0.1 * jax.random.normal(k6, (Cg2,), jnp.float32)

    out = shuffle_attention(x, cweight, cbias, sweight, sbias,
                            gn_weight, gn_bias, G=G)
    out = jax.block_until_ready(out)

    ref = _reference(x, cweight, cbias, sweight, sbias, gn_weight, gn_bias, G=G)
    np.testing.assert_allclose(np.asarray(out), np.asarray(ref),
                               rtol=1e-5, atol=1e-5)
    print("KERNEL_OK")
</pallas_src>

<mosaic_0001>
module attributes {stable_mosaic.version = 11 : i64} {
  func.func @_shuffle_attention_kernel(%arg0: i32, %arg1: i32, %arg2: i32, %arg3: memref<3x32x1xf32, #tpu.memory_space<vmem>>, %arg4: memref<2x32x256xf32, #tpu.memory_space<vmem>>, %arg5: memref<2x32x256xf32, #tpu.memory_space<vmem>>) attributes {dimension_semantics = [#tpu.dimension_semantics<parallel>, #tpu.dimension_semantics<parallel>, #tpu.dimension_semantics<parallel>], iteration_bounds = array<i64: 1, 2, 1>, scalar_prefetch = 0 : i64, scratch_operands = 0 : i64, tpu.core_type = #tpu.core_type<tc>, window_params = [{transform_indices = @transform_0, window_bounds = array<i64: 3, 32, 1>}, {transform_indices = @transform_1, window_bounds = array<i64: 2, 32, 256>}, {transform_indices = @transform_2, window_bounds = array<i64: 2, 32, 256>}]} {
    %c0 = arith.constant 0 : index
    %c0_0 = arith.constant 0 : index
    %c0_1 = arith.constant 0 : index
    %0 = vector.load %arg4[%c0, %c0_0, %c0_1] : memref<2x32x256xf32, #tpu.memory_space<vmem>>, vector<2x32x256xf32>
    %c0_2 = arith.constant 0 : index
    %c0_3 = arith.constant 0 : index
    %c0_4 = arith.constant 0 : index
    %1 = vector.load %arg3[%c0_2, %c0_3, %c0_4] : memref<3x32x1xf32, #tpu.memory_space<vmem>>, vector<1x32x1xf32>
    %2 = vector.shape_cast %1 : vector<1x32x1xf32> to vector<32x1xf32>
    %c1 = arith.constant 1 : index
    %c0_5 = arith.constant 0 : index
    %c0_6 = arith.constant 0 : index
    %3 = vector.load %arg3[%c1, %c0_5, %c0_6] : memref<3x32x1xf32, #tpu.memory_space<vmem>>, vector<1x32x1xf32>
    %4 = vector.shape_cast %3 : vector<1x32x1xf32> to vector<32x1xf32>
    %c2 = arith.constant 2 : index
    %c0_7 = arith.constant 0 : index
    %c0_8 = arith.constant 0 : index
    %5 = vector.load %arg3[%c2, %c0_7, %c0_8] : memref<3x32x1xf32, #tpu.memory_space<vmem>>, vector<1x32x1xf32>
    %6 = vector.shape_cast %5 : vector<1x32x1xf32> to vector<32x1xf32>
    %cst = arith.constant dense<0.000000e+00> : vector<2x32xf32>
    %7 = vector.multi_reduction <add>, %0, %cst [2] : vector<2x32x256xf32> to vector<2x32xf32>
    %8 = vector.shape_cast %7 : vector<2x32xf32> to vector<2x32x1xf32>
    %cst_9 = arith.constant 2.560000e+02 : f32
    %9 = vector.broadcast %cst_9 : f32 to vector<2x32x1xf32>
    %10 = arith.divf %8, %9 : vector<2x32x1xf32>
    %11 = vector.broadcast %10 : vector<2x32x1xf32> to vector<2x32x256xf32>
    %12 = arith.subf %0, %11 : vector<2x32x256xf32>
    %13 = arith.mulf %12, %12 : vector<2x32x256xf32>
    %cst_10 = arith.constant dense<0.000000e+00> : vector<2x32xf32>
    %14 = vector.multi_reduction <add>, %13, %cst_10 [2] : vector<2x32x256xf32> to vector<2x32xf32>
    %15 = vector.shape_cast %14 : vector<2x32xf32> to vector<2x32x1xf32>
    %cst_11 = arith.constant 2.560000e+02 : f32
    %16 = vector.broadcast %cst_11 : f32 to vector<2x32x1xf32>
    %17 = arith.divf %15, %16 : vector<2x32x1xf32>
    %cst_12 = arith.constant 9.99999974E-6 : f32
    %18 = vector.broadcast %cst_12 : f32 to vector<2x32x1xf32>
    %19 = arith.addf %17, %18 : vector<2x32x1xf32>
    %20 = math.rsqrt %19 : vector<2x32x1xf32>
    %21 = vector.shape_cast %6 : vector<32x1xf32> to vector<1x32x1xf32>
    %22 = vector.broadcast %21 : vector<1x32x1xf32> to vector<2x32x1xf32>
    %23 = arith.mulf %22, %20 : vector<2x32x1xf32>
    %24 = vector.broadcast %23 : vector<2x32x1xf32> to vector<2x32x256xf32>
    %25 = arith.mulf %24, %12 : vector<2x32x256xf32>
    %26 = vector.shape_cast %4 : vector<32x1xf32> to vector<1x32x1xf32>
    %27 = vector.broadcast %26 : vector<1x32x1xf32> to vector<2x32x1xf32>
    %28 = arith.mulf %27, %10 : vector<2x32x1xf32>
    %29 = vector.shape_cast %2 : vector<32x1xf32> to vector<1x32x1xf32>
    %30 = vector.broadcast %29 : vector<1x32x1xf32> to vector<2x32x1xf32>
    %31 = arith.addf %28, %30 : vector<2x32x1xf32>
    %32 = vector.broadcast %31 : vector<2x32x1xf32> to vector<2x32x256xf32>
    %33 = arith.addf %25, %32 : vector<2x32x256xf32>
    %34 = arith.negf %33 : vector<2x32x256xf32>
    %35 = math.exp %34 : vector<2x32x256xf32>
    %cst_13 = arith.constant 1.000000e+00 : f32
    %36 = vector.broadcast %cst_13 : f32 to vector<2x32x256xf32>
    %37 = arith.addf %36, %35 : vector<2x32x256xf32>
    %38 = arith.divf %36, %37 : vector<2x32x256xf32>
    %39 = arith.mulf %0, %38 : vector<2x32x256xf32>
    %c0_14 = arith.constant 0 : index
    %c0_15 = arith.constant 0 : index
    %c0_16 = arith.constant 0 : index
    %40 = vector.load %arg5[%c0_14, %c0_15, %c0_16] : memref<2x32x256xf32, #tpu.memory_space<vmem>>, vector<2x32x256xf32>
    tpu.vector_store %arg5[%c0_14, %c0_15, %c0_16], %39 {strides = array<i32>} : memref<2x32x256xf32, #tpu.memory_space<vmem>>, vector<2x32x256xf32>,
    return
  }
  func.func @transform_0(%arg0: i32, %arg1: i32, %arg2: i32) -> (i32, i32, i32) {
    %c1_i32 = arith.constant 1 : i32
    %0 = arith.muli %arg1, %c1_i32 : i32
    %1 = arith.addi %0, %arg2 : i32
    %c0_i32 = arith.constant 0 : i32
    %c0_i32_0 = arith.constant 0 : i32
    %c0_i32_1 = arith.constant 0 : i32
    return %c0_i32, %1, %c0_i32_0 : i32, i32, i32
  }
  func.func @transform_1(%arg0: i32, %arg1: i32, %arg2: i32) -> (i32, i32, i32) {
    %c1_i32 = arith.constant 1 : i32
    %0 = arith.muli %arg1, %c1_i32 : i32
    %1 = arith.addi %0, %arg2 : i32
    %c0_i32 = arith.constant 0 : i32
    %c0_i32_0 = arith.constant 0 : i32
    return %arg0, %1, %c0_i32 : i32, i32, i32
  }
  func.func @transform_2(%arg0: i32, %arg1: i32, %arg2: i32) -> (i32, i32, i32) {
    %c0_i32 = arith.constant 0 : i32
    return %arg0, %arg2, %arg1 : i32, i32, i32
  }
}

</mosaic_0001>

<bundles_post_ra>
// kernel: tpu_custom_call.1
= control target key start
LH: loop header
LB: loop body
LE: loop exit
PB: predicated region body
PF: predicated region fallthrough
CT: control target
= control target key end

     0   :  { %7 = vsyncpa [#allocation4], 0  ;;  %s1565_s0 = inlined_call_operand.vmem [shape: f32[3,64,1], index: 0, kind: input, shape index: {}]   ;;  %s1566_s1 = inlined_call_operand.hbm [shape: f32[2,64,256], index: 1, kind: input, shape index: {}]   ;;  %s1567_s2 = inlined_call_operand.hbm [shape: f32[2,32,512], index: 2, kind: output, shape index: {}]  }
   0x1   :  { %9 = vsyncpa [#allocation4 + $0x1], 0 }
   0x2   :  { %10 = vsyncpa [#allocation5], 0 }
   0x3   :  { %12 = vsyncpa [#allocation5 + $0x1], 0  ;;  %s1183_s9 = smov 0   ;;  %s1185_s10 = smov 0  }
   0x4   :  { %s1187_s11 = smov 0   ;;  %s1189_s12 = smov 0  }
   0x5   :  { %s1191_s13 = smov 0   ;;  %s1193_s14 = smov 0  }
   0x6 LB: > { %s869_s15 = sadd.s32 4294967295, %s1155_s14   ;;  %s870_s16 = sadd.s32 4294967294, %s1155_s14   ;;  %s1155_s14 = sphi %s1193_s14, %s18_s14   ;;  %s1151_s13 = sphi %s1191_s13, %s1576_s13   ;;  %s1147_s12 = sphi %s1189_s12, %s1575_s12   ;;  %s1143_s11 = sphi %s1187_s11, %s1574_s11   ;;  %s1139_s10 = sphi %s1185_s10, %s1573_s10   ;;  %s1135_s9 = sphi %s1183_s9, %s1572_s9  }
   0x7   : > { %s33_s17 = sadd.s32 1, %s1151_s13  ;;  %s46_s18 = sadd.s32 1, %s1143_s11 }
   0x8   : > { %p35_p0 = scmp.ge.s32.totalorder %s33_s17, 2  ;;  %p53_p1 = scmp.ne.s32.totalorder %s1143_s11, %s1139_s10 }
   0x9   : > { %p54_p2 = scmp.eq.s32.totalorder %s1155_s14, 0  ;;  %p89_p3 = scmp.ne.s32.totalorder %s1139_s10, %s1135_s9 }
   0xa   : > { %s1578_s17 = smov (%p35_p0, %s33_s17), 0  ;;  %p90_p5 = scmp.eq.s32.totalorder %s869_s15, 0 }
   0xb   : > { %p1224_p4 = por %p54_p2, %p53_p1  ;;  %s43_s20 = ssub.s32 %s1151_s13, %s1578_s17 }
   0xc   : > { %p117_p6 = scmp.eq.s32.totalorder %s869_s15, 1  ;;  %p44_p7 = scmp.eq.s32.totalorder %s43_s20, 0 }
   0xd   : > { %p1230_p8 = por %p90_p5, %p89_p3  ;;  %p123_p10 = scmp.eq.s32.totalorder %s870_s16, 1 }
   0xe   : > { %p1234_p9 = por %p117_p6, %p53_p1  ;;  %p872_p12 = scmp.ge.s32.totalorder %s1155_s14, 2 }
   0xf   : > { %s1239_s23 = scalar_select %p44_p7, %s1143_s11, %s46_s18  }
  0x10   : > { %p1241_p11 = por %p123_p10, %p89_p3  ;;  %139 = sbr.rel (%p872_p12) target bundleno = 45 (0x2d), region = 16 }
  0x15   : > { %142 = sbr.rel (!%p1224_p4) target bundleno = 32 (0x20), region = 20  ;;  %s144_s25 = sand.u32 (%p1224_p4), 1, %s1143_s11  }
  0x16   : > { %s913_s26 = sshll.u32 (%p1224_p4), %s1151_s13, 5  ;;  %s917_s27 = smul.u32 (%p1224_p4), 96, %s144_s25 }
  0x17   : > { %s150_s30 = scalar_lea.vmem (%p1224_p4), %s1565_s0, %s913_s26 }
  0x18   : > { %v201_v0 = vld [vmem:[%s150_s30] sm:$0xff] (%p1224_p4)  ;;  %v203_v1 = vld [vmem:[%s150_s30 + $0x8] sm:$0xff] (%p1224_p4)  ;;  %v205_v2 = vld [vmem:[%s150_s30 + $0x10] sm:$0xff] (%p1224_p4)  ;;  %s146_s3 = scalar_lea.vmem (%p1224_p4), [#allocation2], %s917_s27 }
  0x19   : > { %v207_v3 = vld [vmem:[%s150_s30 + $0x18] sm:$0xff] (%p1224_p4)  ;;  %v209_v4 = vld [vmem:[%s150_s30 + $0x40] sm:$0xff] (%p1224_p4)  ;;  %v211_v5 = vld [vmem:[%s150_s30 + $0x48] sm:$0xff] (%p1224_p4)  ;;  %202 = vst [vmem:[%s146_s3] sm:$0xff] (%p1224_p4), %v201_v0 }
  0x1a   : > { %204 = vst [vmem:[%s146_s3 + $0x8] sm:$0xff] %v203_v1  ;;  %206 = vst [vmem:[%s146_s3 + $0x10] sm:$0xff] %v205_v2  ;;  %v213_v6 = vld [vmem:[%s150_s30 + $0x50] sm:$0xff]  ;;  %v215_v7 = vld [vmem:[%s150_s30 + $0x58] sm:$0xff] }
  0x1b   : > { %208 = vst [vmem:[%s146_s3 + $0x18] sm:$0xff] %v207_v3  ;;  %210 = vst [vmem:[%s146_s3 + $0x20] sm:$0xff] %v209_v4  ;;  %v217_v8 = vld [vmem:[%s150_s30 + $0x80] sm:$0xff]  ;;  %v219_v9 = vld [vmem:[%s150_s30 + $0x88] sm:$0xff] }
  0x1c   : > { %212 = vst [vmem:[%s146_s3 + $0x28] sm:$0xff] %v211_v5  ;;  %214 = vst [vmem:[%s146_s3 + $0x30] sm:$0xff] %v213_v6  ;;  %v221_v10 = vld [vmem:[%s150_s30 + $0x90] sm:$0xff]  ;;  %v223_v11 = vld [vmem:[%s150_s30 + $0x98] sm:$0xff] }
  0x1d   : > { %216 = vst [vmem:[%s146_s3 + $0x38] sm:$0xff] %v215_v7  ;;  %218 = vst [vmem:[%s146_s3 + $0x40] sm:$0xff] %v217_v8 }
  0x1e   : > { %220 = vst [vmem:[%s146_s3 + $0x48] sm:$0xff] %v219_v9  ;;  %222 = vst [vmem:[%s146_s3 + $0x50] sm:$0xff] %v221_v10 }
  0x1f   : > { %224 = vst [vmem:[%s146_s3 + $0x58] sm:$0xff] %v223_v11 }
  0x20 PF: > { %s231_s4 = sand.u32 1, %s1143_s11   ;;  %s915_s5 = sshll.u32 %s1151_s13, 10 }
  0x21   : > { %s875_s6 = sshll.u32 %s231_s4, 7  ;;  %s246_s15 = scalar_lea.hbm %s1566_s1, %s915_s5 }
  0x22   : > { %s919_s16 = scalar_select %p1224_p4, [#allocation0], [#allocation9] }
  0x23   : > { %s235_s18 = scalar_lea.vmem [#allocation3], %s875_s6  ;;  %s1157_s26 = smov 2048  }
  0x24   : > { %s259_s20 = sshll.u32 %s235_s18, 4  ;;  %s251_s25 = sld [smem:[%s919_s16]]   ;;  %s260_s20 = int_to_ptr.vmem [resolvable:$true] %s259_s20 }
  0x25   : > { %920 = sst [smem:[#allocation8]] (%p1224_p4), %s1157_s26  ;;  %s1158_s27 = smov 1024  }
  0x26   : > { %921 = sst [smem:[#allocation8 + $0x1]] (%p1224_p4), %s1158_s27  ;;  %s1159_s28 = smov 4  }
  0x27   : > { %922 = sst [smem:[#allocation8 + $0x2]] (%p1224_p4), %s1159_s28  ;;  %s1160_s29 = smov 256  }
  0x28   : > { %923 = sst [smem:[#allocation8 + $0x3]] (%p1224_p4), %s1160_s29  ;;  %s1161_s3 = smov 16  }
  0x29   : > { %924 = sst [smem:[#allocation8 + $0x4]] (%p1224_p4), %s1160_s29  ;;  %s232_s6 = scalar_lea.sflag [#allocation4], %s231_s4 }
  0x2a   : > { %s879_s30 = sshll.u32 %s251_s25, 26  ;;  %925 = sst [smem:[#allocation8 + $0x5]] (%p1224_p4), %s1161_s3 }
  0x2b   : > { %s880_s5 = sadd.s32 134217728, %s879_s30  ;;  %s1162_s7 = smov 131072  }
  0x2c   : > { %926 = dma.general (%p1224_p4), %s246_s15, 2048, %s260_s20, %s232_s6, %s1162_s7, [#allocation8], %s880_s5, 0  }
  0x2d PF: > { %p881_p13 = scmp.ge.s32.totalorder %s1155_s14, 1  ;;  %p280_p0 = scmp.lt.s32.totalorder %s1155_s14, 3 }
  0x2f   : > { %p281_p1 = pnand %p881_p13, %p280_p0 }
  0x30   : > { %s1279_s8 = sand.u32 (!%p281_p1), 1, %s1139_s10  }
  0x31   : > { %284 = sbr.rel (%p281_p1) target bundleno = 572 (0x23c), region = 62  ;;  %s882_s4 = sshll.u32 (!%p281_p1), %s1279_s8, 7 }
  0x32   : > { %s918_s16 = smul.u32 (!%p281_p1), 96, %s1279_s8  ;;  %s294_s19 = scalar_lea.sflag (!%p281_p1), [#allocation4], %s1279_s8 }
  0x33   : > { %s297_s15 = scalar_lea.vmem (!%p281_p1), [#allocation3], %s882_s4 }
  0x34   : > { %s1283_s18 = scalar_lea.vmem (!%p281_p1), [#allocation2], %s918_s16 }
  0x36   : > { %1126 = dma.done.wait (%p1230_p8), %s294_s19, 2048  }
  0x37   : > { %1128 = vsyncadd (%p1230_p8), %s294_s19, 4294965248  ;;  %v1292_v12 = vld [vmem:[%s297_s15] sm:$0xff]  ;;  %v1294_v13 = vld [vmem:[%s297_s15 + $0x8] sm:$0xff]  ;;  %v1163_v36 = vmov 0   ;;  %s1478_s21 = scalar_lea.vmem [#allocation6], %s882_s4  ;;  %s916_s20 = sshll.u32 %s1147_s12, 8 }
  0x38   : > { %v1296_v14 = vld [vmem:[%s297_s15 + $0x20] sm:$0xff]  ;;  %v360_v15 = vadd.f32 %v1294_v13, %v1292_v12  ;;  %v1300_v16 = vld [vmem:[%s297_s15 + $0x28] sm:$0xff]  ;;  %v1302_v17 = vld [vmem:[%s297_s15 + $0x10] sm:$0xff]  ;;  %993 = vset.pattern.permute.xlu1 %v1163_v36  ;;  %994 = vset.pattern.permute.xlu0 %v1163_v36  ;;  %s757_s25 = sshll.u32 %s1478_s21, 4  ;;  %s1509_s28 = scalar_lea.hbm %s1567_s2, %s916_s20  ;;  %s1513_s25 = int_to_ptr.vmem [resolvable:$true] %s757_s25 }
  0x39   : > { %v1304_v18 = vld [vmem:[%s297_s15 + $0x18] sm:$0xff]  ;;  %v366_v19 = vadd.f32 %v1300_v16, %v1296_v14  ;;  %v1308_v20 = vld [vmem:[%s297_s15 + $0x30] sm:$0xff]  ;;  %v1316_v24 = vld [vmem:[%s297_s15 + $0x40] sm:$0xff]  ;;  %s738_s12 = scalar_lea.sflag [#allocation5], %s1279_s8  ;;  %s1075_s29 = scalar_lea.vmem %s1513_s25, 2048 }
  0x3a   : > { %v1310_v21 = vld [vmem:[%s297_s15 + $0x38] sm:$0xff]  ;;  %361 = vadd.xlane.f32.xlu0 %v360_v15  ;;  %v363_v22 = vadd.f32 %v1304_v18, %v1302_v17  ;;  %v1318_v25 = vld [vmem:[%s297_s15 + $0x48] sm:$0xff]  ;;  %v1320_v26 = vld [vmem:[%s297_s15 + $0x50] sm:$0xff]  ;;  %p1076_p2 = scmp.ne.s32.totalorder %s1513_s25, %s1075_s29  ;;  %s1164_s30 = smov [#allocation6]  }
  0x3b   : > { %367 = vadd.xlane.f32.xlu1 %v366_v19  ;;  %v369_v23 = vadd.f32 %v1310_v21, %v1308_v20  ;;  %v1322_v27 = vld [vmem:[%s297_s15 + $0x58] sm:$0xff]  ;;  %v372_v28 = vadd.f32 %v1318_v25, %v1316_v24  ;;  %v1328_v30 = vld [vmem:[%s297_s15 + $0x60] sm:$0xff]  ;;  %v1330_v31 = vld [vmem:[%s297_s15 + $0x68] sm:$0xff]  ;;  %s1079_s3 = sshll.u32 %s1164_s30, 4  ;;  %s1080_s3 = int_to_ptr.vmem [resolvable:$false] %s1079_s3 }
  0x3c   : > { %v375_v29 = vadd.f32 %v1322_v27, %v1320_v26  ;;  %v1332_v32 = vld [vmem:[%s297_s15 + $0x70] sm:$0xff]  ;;  %v1334_v33 = vld [vmem:[%s297_s15 + $0x78] sm:$0xff]  ;;  %v378_v34 = vadd.f32 %v1330_v31, %v1328_v30  ;;  %p1077_p3 = pnand %p1076_p2, %p1234_p9  ;;  %s1081_s5 = scalar_lea.vmem %s1080_s3, 4096 }
  0x3d   : > { %v381_v35 = vadd.f32 %v1334_v33, %v1332_v32  ;;  %p1082_p5 = scmp.lt.s32.totalorder %s1513_s25, %s1080_s3  ;;  %p1083_p6 = scmp.lt.s32.totalorder %s1081_s5, %s1075_s29 }
  0x3e   : > { %364 = vadd.xlane.f32.xlu0 %v363_v22  ;;  %v886_v22 = vld [vmem:[%s1283_s18 + $0x30] sm:$0xff]  ;;  %p1078_p4 = pneg %p1077_p3 }
  0x3f   : > { %370 = vadd.xlane.f32.xlu1 %v369_v23  ;;  %p1084_p7 = por %p1083_p6, %p1082_p5 }
  0x41   : > { %p1085_p8 = pnand %p1084_p7, %p1078_p4 }
  0x42   : > { %373 = vadd.xlane.f32.xlu0 %v372_v28 }
  0x43   : > { %376 = vadd.xlane.f32.xlu1 %v375_v29 }
  0x46   : > { %379 = vadd.xlane.f32.xlu0 %v378_v34  ;;  %v887_v34 = vld [vmem:[%s1283_s18 + $0x38] sm:$0xff] }
  0x47   : > { %382 = vadd.xlane.f32.xlu1 %v381_v35 }
  0xc3   : > { %v362_v37 = vpop.xlane.xlu0 %361 }
  0xc4   : > { %v1340_v38 = vmul.f32 0.00390625, %v362_v37  ;;  %v368_v39 = vpop.xlane.xlu1 %367 }
  0xc5   : > { %v1342_v40 = vmul.f32 0.00390625, %v368_v39 }
  0xc6   : > { %v1346_v41 = vsub.f32 %v1292_v12, %v1340_v38  ;;  %v1350_v42 = vsub.f32 %v1294_v13, %v1340_v38 }
  0xc7   : > { %v1354_v43 = vsub.f32 %v1296_v14, %v1342_v40  ;;  %v1358_v44 = vsub.f32 %v1300_v16, %v1342_v40  ;;  %v365_v45 = vpop.xlane.xlu0 %364 }
  0xc8   : > { %v1360_v46 = vmul.f32 0.00390625, %v365_v45  ;;  %v371_v47 = vpop.xlane.xlu1 %370  ;;  %v409_v48 = vmul.f32 %v1346_v41, %v1346_v41  ;;  %v410_v49 = vmul.f32 %v1350_v42, %v1350_v42 }
  0xc9   : > { %v1366_v50 = vmul.f32 0.00390625, %v371_v47  ;;  %v413_v51 = vmul.f32 %v1354_v43, %v1354_v43  ;;  %v414_v52 = vmul.f32 %v1358_v44, %v1358_v44 }
  0xca   : > { %v1374_v53 = vsub.f32 %v1302_v17, %v1360_v46  ;;  %v1378_v54 = vsub.f32 %v1304_v18, %v1360_v46  ;;  %v425_v55 = vadd.f32 %v410_v49, %v409_v48 }
  0xcb   : > { %v1382_v56 = vsub.f32 %v1308_v20, %v1366_v50  ;;  %v1386_v57 = vsub.f32 %v1310_v21, %v1366_v50  ;;  %v374_v58 = vpop.xlane.xlu0 %373  ;;  %v431_v61 = vadd.f32 %v414_v52, %v413_v51  ;;  %v348_v51 = vld [vmem:[%s1283_s18 + $0x10] sm:$0xff] }
  0xcc   : > { %v389_v59 = vmul.f32 0.00390625, %v374_v58  ;;  %426 = vadd.xlane.f32.xlu0 %v425_v55  ;;  %v377_v60 = vpop.xlane.xlu1 %376  ;;  %v411_v62 = vmul.f32 %v1374_v53, %v1374_v53  ;;  %v412_v63 = vmul.f32 %v1378_v54, %v1378_v54  ;;  %v349_v58 = vld [vmem:[%s1283_s18 + $0x18] sm:$0xff] }
  0xcd   : > { %v390_v0 = vmul.f32 0.00390625, %v377_v60  ;;  %v415_v1 = vmul.f32 %v1382_v56, %v1382_v56  ;;  %v416_v2 = vmul.f32 %v1386_v57, %v1386_v57 }
  0xce   : > { %v1397_v3 = vsub.f32 %v1316_v24, %v389_v59  ;;  %v1400_v4 = vsub.f32 %v1318_v25, %v389_v59  ;;  %v428_v5 = vadd.f32 %v412_v63, %v411_v62 }
  0xcf   : > { %v1403_v6 = vsub.f32 %v1320_v26, %v390_v0  ;;  %v1406_v7 = vsub.f32 %v1322_v27, %v390_v0  ;;  %v380_v8 = vpop.xlane.xlu0 %379  ;;  %v434_v11 = vadd.f32 %v416_v2, %v415_v1 }
  0xd0   : > { %v391_v9 = vmul.f32 0.00390625, %v380_v8  ;;  %432 = vadd.xlane.f32.xlu0 %v431_v61  ;;  %429 = vadd.xlane.f32.xlu1 %v428_v5  ;;  %v383_v10 = vpop.xlane.xlu1 %382  ;;  %v417_v15 = vmul.f32 %v1397_v3, %v1397_v3  ;;  %v418_v19 = vmul.f32 %v1400_v4, %v1400_v4  ;;  %v884_v5 = vld [vmem:[%s1283_s18 + $0x20] sm:$0xff]  ;;  %v885_v8 = vld [vmem:[%s1283_s18 + $0x28] sm:$0xff] }
  0xd1   : > { %v392_v23 = vmul.f32 0.00390625, %v383_v10  ;;  %v419_v28 = vmul.f32 %v1403_v6, %v1403_v6  ;;  %v420_v29 = vmul.f32 %v1406_v7, %v1406_v7  ;;  %v538_v10 = vmul.f32 %v885_v8, %v1360_v46 }
  0xd2   : > { %v1419_v35 = vsub.f32 %v1328_v30, %v391_v9  ;;  %v1422_v36 = vsub.f32 %v1330_v31, %v391_v9  ;;  %v543_v37 = vmul.f32 %v886_v22, %v391_v9  ;;  %v437_v39 = vadd.f32 %v418_v19, %v417_v15  ;;  %v347_v15 = vld [vmem:[%s1283_s18 + $0x8] sm:$0xff] }
  0xd3   : > { %v1425_v45 = vsub.f32 %v1332_v32, %v392_v23  ;;  %v1428_v47 = vsub.f32 %v1334_v33, %v392_v23  ;;  %v544_v48 = vmul.f32 %v887_v34, %v392_v23  ;;  %v440_v49 = vadd.f32 %v420_v29, %v419_v28 }
  0xd4   : > { %435 = vadd.xlane.f32.xlu1 %v434_v11  ;;  %438 = vadd.xlane.f32.xlu0 %v437_v39  ;;  %v421_v52 = vmul.f32 %v1419_v35, %v1419_v35  ;;  %v422_v55 = vmul.f32 %v1422_v36, %v1422_v36  ;;  %v1436_v60 = vadd.f32 %v543_v37, %v348_v51  ;;  %v346_v11 = vld [vmem:[%s1283_s18] sm:$0xff] }
  0xd5   : > { %v423_v61 = vmul.f32 %v1425_v45, %v1425_v45  ;;  %v424_v62 = vmul.f32 %v1428_v47, %v1428_v47  ;;  %v1442_v63 = vadd.f32 %v544_v48, %v349_v58  ;;  %v537_v9 = vmul.f32 %v884_v5, %v1340_v38 }
  0xd6   : > { %v443_v1 = vadd.f32 %v422_v55, %v421_v52  ;;  %v539_v19 = vmul.f32 %v886_v22, %v1342_v40  ;;  %v540_v28 = vmul.f32 %v887_v34, %v1366_v50  ;;  %v546_v29 = vadd.f32 %v538_v10, %v347_v15 }
  0xd7   : > { %v446_v2 = vadd.f32 %v424_v62, %v423_v61  ;;  %v545_v23 = vadd.f32 %v537_v9, %v346_v11  ;;  %v541_v37 = vmul.f32 %v884_v5, %v389_v59  ;;  %v542_v48 = vmul.f32 %v885_v8, %v390_v0 }
  0xd8   : > { %441 = vadd.xlane.f32.xlu1 %v440_v49  ;;  %444 = vadd.xlane.f32.xlu0 %v443_v1  ;;  %v547_v39 = vadd.f32 %v539_v19, %v348_v51  ;;  %v548_v49 = vadd.f32 %v540_v28, %v349_v58 }
  0xd9   : > { %v549_v52 = vadd.f32 %v541_v37, %v346_v11  ;;  %v550_v38 = vadd.f32 %v542_v48, %v347_v15  ;;  %v888_v11 = vld [vmem:[%s1283_s18 + $0x40] sm:$0xff]  ;;  %v889_v37 = vld [vmem:[%s1283_s18 + $0x48] sm:$0xff] }
  0xdc   : > { %447 = vadd.xlane.f32.xlu1 %v446_v2 }
  0xed   : > { %555 = vperm.xlu1 %993, %v545_v23  }
  0xee   : > { %560 = vperm.xlu0 %994, %v546_v29  }
  0xf1   : > { %565 = vperm.xlu1 %993, %v547_v39  }
  0xf2   : > { %570 = vperm.xlu0 %994, %v548_v49  }
  0xf5   : > { %575 = vperm.xlu1 %993, %v549_v52   ;;  %v890_v52 = vld [vmem:[%s1283_s18 + $0x50] sm:$0xff] }
  0xf6   : > { %580 = vperm.xlu0 %994, %v550_v38  }
 0x155   : > { %v427_v46 = vpop.xlane.xlu0 %426 }
 0x156   : > { %v449_v55 = vmul.f32 0.00390625, %v427_v46 }
 0x158   : > { %v457_v61 = vadd.f32 1e-05, %v449_v55 }
 0x159   : > { %v430_v40 = vpop.xlane.xlu1 %429  ;;  %v433_v22 = vpop.xlane.xlu0 %432 }
 0x15a   : > { %995 = vrsqrt.f32 %v457_v61  ;;  %v450_v50 = vmul.f32 0.00390625, %v430_v40  ;;  %v451_v34 = vmul.f32 0.00390625, %v433_v22  ;;  %v891_v22 = vld [vmem:[%s1283_s18 + $0x58] sm:$0xff] }
 0x15c   : > { %v458_v62 = vadd.f32 1e-05, %v450_v50  ;;  %v459_v59 = vadd.f32 1e-05, %v451_v34 }
 0x15d   : > { %v436_v51 = vpop.xlane.xlu1 %435  ;;  %v439_v0 = vpop.xlane.xlu0 %438 }
 0x15e   : > { %997 = vrsqrt.f32 %v458_v62  ;;  %v452_v58 = vmul.f32 0.00390625, %v436_v51  ;;  %v453_v1 = vmul.f32 0.00390625, %v439_v0 }
 0x15f   : > { %999 = vrsqrt.f32 %v459_v59 }
 0x160   : > { %v460_v2 = vadd.f32 1e-05, %v452_v58  ;;  %v461_v9 = vadd.f32 1e-05, %v453_v1 }
 0x161   : > { %v442_v5 = vpop.xlane.xlu1 %441  ;;  %v445_v10 = vpop.xlane.xlu0 %444 }
 0x162   : > { %1001 = vrsqrt.f32 %v460_v2  ;;  %v454_v8 = vmul.f32 0.00390625, %v442_v5  ;;  %v455_v19 = vmul.f32 0.00390625, %v445_v10 }
 0x163   : > { %1003 = vrsqrt.f32 %v461_v9 }
 0x164   : > { %v462_v15 = vadd.f32 1e-05, %v454_v8  ;;  %v463_v48 = vadd.f32 1e-05, %v455_v19 }
 0x165   : > { %v448_v29 = vpop.xlane.xlu1 %447 }
 0x166   : > { %1005 = vrsqrt.f32 %v462_v15  ;;  %v456_v39 = vmul.f32 0.00390625, %v448_v29 }
 0x167   : > { %v996_v23 = vpop.eup %995  ;;  %1007 = vrsqrt.f32 %v463_v48 }
 0x168   : > { %v473_v28 = vmul.f32 %v996_v23, %v888_v11  ;;  %v464_v55 = vadd.f32 1e-05, %v456_v39 }
 0x169   : > { %v556_v5 = vpop.permute.xlu1 %555 }
 0x16a   : > { %483 = vperm.xlu0 %994, %v473_v28   ;;  %1009 = vrsqrt.f32 %v464_v55 }
 0x16b   : > { %v998_v49 = vpop.eup %997 }
 0x16c   : > { %v1000_v38 = vpop.eup %999  ;;  %v474_v46 = vmul.f32 %v998_v49, %v889_v37 }
 0x16d   : > { %v475_v61 = vmul.f32 %v1000_v38, %v890_v52  ;;  %v566_v9 = vpop.permute.xlu1 %565 }
 0x16e   : > { %488 = vperm.xlu1 %993, %v474_v46   ;;  %590 = vperm.xlu0 %994, %v1442_v63   ;;  %v561_v63 = vpop.permute.xlu0 %560 }
 0x16f   : > { %v1002_v40 = vpop.eup %1001 }
 0x170   : > { %v476_v50 = vmul.f32 %v1002_v40, %v891_v22  ;;  %v1004_v34 = vpop.eup %1003 }
 0x171   : > { %v477_v62 = vmul.f32 %v1004_v34, %v888_v11  ;;  %v576_v15 = vpop.permute.xlu1 %575 }
 0x172   : > { %493 = vperm.xlu1 %993, %v475_v61   ;;  %v571_v8 = vpop.permute.xlu0 %570 }
 0x173   : > { %v1006_v59 = vpop.eup %1005 }
 0x174   : > { %v478_v51 = vmul.f32 %v1006_v59, %v889_v37  ;;  %v1008_v0 = vpop.eup %1007 }
 0x175   : > { %v479_v58 = vmul.f32 %v1008_v0, %v890_v52 }
 0x176   : > { %498 = vperm.xlu1 %993, %v476_v50   ;;  %v581_v10 = vpop.permute.xlu0 %580 }
 0x177   : > { %v1010_v1 = vpop.eup %1009 }
 0x178   : > { %v480_v2 = vmul.f32 %v1010_v1, %v891_v22 }
 0x17a   : > { %503 = vperm.xlu1 %993, %v477_v62  }
 0x17e   : > { %508 = vperm.xlu1 %993, %v478_v51  }
 0x182   : > { %513 = vperm.xlu1 %993, %v479_v58  }
 0x186   : > { %518 = vperm.xlu1 %993, %v480_v2  }
 0x18a   : > { %585 = vperm.xlu1 %993, %v1436_v60  }
 0x1e5   : > { %v484_v19 = vpop.permute.xlu0 %483 }
 0x1e6   : > { %v521_v11 = vmul.f32 %v484_v19, %v1346_v41  ;;  %v522_v23 = vmul.f32 %v484_v19, %v1350_v42 }
 0x1e8   : > { %v593_v28 = vadd.f32 %v556_v5, %v521_v11  ;;  %v594_v29 = vadd.f32 %v556_v5, %v522_v23 }
 0x1e9   : > { %v489_v37 = vpop.permute.xlu1 %488 }
 0x1ea   : > { %v892_v39 = vmul.f32 -1.442695, %v593_v28  ;;  %v893_v48 = vmul.f32 -1.442695, %v594_v29  ;;  %v523_v49 = vmul.f32 %v489_v37, %v1374_v53  ;;  %v524_v60 = vmul.f32 %v489_v37, %v1378_v54 }
 0x1ec   : > { %1011 = vpow2.f32 %v892_v39  ;;  %v595_v52 = vadd.f32 %v561_v63, %v523_v49  ;;  %v596_v38 = vadd.f32 %v561_v63, %v524_v60 }
 0x1ed   : > { %1013 = vpow2.f32 %v893_v48  ;;  %v494_v46 = vpop.permute.xlu1 %493 }
 0x1ee   : > { %v894_v55 = vmul.f32 -1.442695, %v595_v52  ;;  %v895_v61 = vmul.f32 -1.442695, %v596_v38  ;;  %v525_v41 = vmul.f32 %v494_v46, %v1354_v43  ;;  %v526_v42 = vmul.f32 %v494_v46, %v1358_v44 }
 0x1f0   : > { %1015 = vpow2.f32 %v894_v55  ;;  %v597_v40 = vadd.f32 %v566_v9, %v525_v41  ;;  %v598_v22 = vadd.f32 %v566_v9, %v526_v42 }
 0x1f1   : > { %1017 = vpow2.f32 %v895_v61  ;;  %v499_v50 = vpop.permute.xlu1 %498 }
 0x1f2   : > { %v896_v34 = vmul.f32 -1.442695, %v597_v40  ;;  %v897_v53 = vmul.f32 -1.442695, %v598_v22  ;;  %v527_v54 = vmul.f32 %v499_v50, %v1382_v56  ;;  %v528_v62 = vmul.f32 %v499_v50, %v1386_v57 }
 0x1f4   : > { %1019 = vpow2.f32 %v896_v34  ;;  %v599_v59 = vadd.f32 %v571_v8, %v527_v54  ;;  %v600_v51 = vadd.f32 %v571_v8, %v528_v62 }
 0x1f5   : > { %1021 = vpow2.f32 %v897_v53  ;;  %v504_v0 = vpop.permute.xlu1 %503 }
 0x1f6   : > { %v898_v58 = vmul.f32 -1.442695, %v599_v59  ;;  %v899_v43 = vmul.f32 -1.442695, %v600_v51  ;;  %v529_v44 = vmul.f32 %v504_v0, %v1397_v3  ;;  %v530_v1 = vmul.f32 %v504_v0, %v1400_v4 }
 0x1f8   : > { %1023 = vpow2.f32 %v898_v58  ;;  %v601_v2 = vadd.f32 %v576_v15, %v529_v44  ;;  %v602_v63 = vadd.f32 %v576_v15, %v530_v1 }
 0x1f9   : > { %v1012_v5 = vpop.eup %1011  ;;  %1025 = vpow2.f32 %v899_v43  ;;  %v509_v9 = vpop.permute.xlu1 %508 }
 0x1fa   : > { %v1014_v56 = vpop.eup %1013  ;;  %v657_v19 = vadd.f32 1.0, %v1012_v5  ;;  %v900_v57 = vmul.f32 -1.442695, %v601_v2  ;;  %v531_v11 = vmul.f32 %v509_v9, %v1403_v6  ;;  %v901_v23 = vmul.f32 -1.442695, %v602_v63 }
 0x1fb   : > { %v658_v8 = vadd.f32 1.0, %v1014_v56  ;;  %v532_v28 = vmul.f32 %v509_v9, %v1406_v7 }
 0x1fc   : > { %1027 = vrcp.f32 %v657_v19  ;;  %v603_v29 = vadd.f32 %v581_v10, %v531_v11 }
 0x1fd   : > { %v1016_v3 = vpop.eup %1015  ;;  %1029 = vrcp.f32 %v658_v8  ;;  %v604_v4 = vadd.f32 %v581_v10, %v532_v28  ;;  %v514_v37 = vpop.permute.xlu1 %513 }
 0x1fe   : > { %v1018_v39 = vpop.eup %1017  ;;  %v659_v15 = vadd.f32 1.0, %v1016_v3  ;;  %1031 = vpow2.f32 %v900_v57  ;;  %v902_v48 = vmul.f32 -1.442695, %v603_v29  ;;  %v591_v10 = vpop.permute.xlu0 %590  ;;  %v533_v41 = vmul.f32 %v514_v37, %v1419_v35 }
 0x1ff   : > { %v660_v49 = vadd.f32 1.0, %v1018_v39  ;;  %1033 = vpow2.f32 %v901_v23  ;;  %v903_v60 = vmul.f32 -1.442695, %v604_v4  ;;  %v534_v50 = vmul.f32 %v514_v37, %v1422_v36 }
 0x200   : > { %1035 = vrcp.f32 %v659_v15 }
 0x201   : > { %v1020_v52 = vpop.eup %1019  ;;  %1037 = vrcp.f32 %v660_v49  ;;  %v519_v6 = vpop.permute.xlu1 %518 }
 0x202   : > { %v1022_v38 = vpop.eup %1021  ;;  %v661_v46 = vadd.f32 1.0, %v1020_v52  ;;  %1039 = vpow2.f32 %v902_v48  ;;  %v535_v7 = vmul.f32 %v519_v6, %v1425_v45  ;;  %v536_v55 = vmul.f32 %v519_v6, %v1428_v47 }
 0x203   : > { %v662_v61 = vadd.f32 1.0, %v1022_v38  ;;  %1041 = vpow2.f32 %v903_v60 }
 0x204   : > { %1043 = vrcp.f32 %v661_v46  ;;  %v607_v42 = vadd.f32 %v591_v10, %v535_v7  ;;  %v608_v40 = vadd.f32 %v591_v10, %v536_v55 }
 0x205   : > { %v1024_v22 = vpop.eup %1023  ;;  %1045 = vrcp.f32 %v662_v61  ;;  %v586_v34 = vpop.permute.xlu1 %585 }
 0x206   : > { %v1026_v53 = vpop.eup %1025  ;;  %v663_v54 = vadd.f32 1.0, %v1024_v22  ;;  %v906_v62 = vmul.f32 -1.442695, %v607_v42  ;;  %v605_v59 = vadd.f32 %v586_v34, %v533_v41  ;;  %v907_v47 = vmul.f32 -1.442695, %v608_v40 }
 0x207   : > { %v664_v45 = vadd.f32 1.0, %v1026_v53  ;;  %v606_v51 = vadd.f32 %v586_v34, %v534_v50 }
 0x208   : > { %1047 = vrcp.f32 %v663_v54  ;;  %v904_v0 = vmul.f32 -1.442695, %v605_v59 }
 0x209   : > { %v1028_v58 = vpop.eup %1027  ;;  %1049 = vrcp.f32 %v664_v45  ;;  %v905_v35 = vmul.f32 -1.442695, %v606_v51 }
 0x20a   : > { %v1030_v43 = vpop.eup %1029  ;;  %v705_v44 = vmul.f32 %v1028_v58, %v1292_v12  ;;  %1051 = vpow2.f32 %v906_v62 }
 0x20b   : > { %v1032_v1 = vpop.eup %1031  ;;  %v706_v36 = vmul.f32 %v1030_v43, %v1294_v13  ;;  %1053 = vpow2.f32 %v907_v47 }
 0x20c   : > { %v1034_v2 = vpop.eup %1033  ;;  %721 = vst [vmem:[%s1478_s21] sm:$0xff] %v705_v44  ;;  %v665_v63 = vadd.f32 1.0, %v1032_v1  ;;  %1055 = vpow2.f32 %v904_v0 }
 0x20d   : > { %v1036_v5 = vpop.eup %1035  ;;  %722 = vst [vmem:[%s1478_s21 + $0x8] sm:$0xff] %v706_v36  ;;  %v666_v9 = vadd.f32 1.0, %v1034_v2  ;;  %1057 = vpow2.f32 %v905_v35 }
 0x20e   : > { %v1038_v12 = vpop.eup %1037  ;;  %v707_v56 = vmul.f32 %v1036_v5, %v1302_v17  ;;  %1059 = vrcp.f32 %v665_v63 }
 0x20f   : > { %v1040_v13 = vpop.eup %1039  ;;  %v708_v19 = vmul.f32 %v1038_v12, %v1304_v18  ;;  %1061 = vrcp.f32 %v666_v9 }
 0x210   : > { %v1042_v57 = vpop.eup %1041  ;;  %723 = vst [vmem:[%s1478_s21 + $0x10] sm:$0xff] %v707_v56  ;;  %v667_v11 = vadd.f32 1.0, %v1040_v13 }
 0x211   : > { %v1044_v8 = vpop.eup %1043  ;;  %724 = vst [vmem:[%s1478_s21 + $0x18] sm:$0xff] %v708_v19  ;;  %v668_v23 = vadd.f32 1.0, %v1042_v57 }
 0x212   : > { %v1046_v28 = vpop.eup %1045  ;;  %v709_v29 = vmul.f32 %v1044_v8, %v1296_v14  ;;  %1063 = vrcp.f32 %v667_v11 }
 0x213   : > { %v710_v17 = vmul.f32 %v1046_v28, %v1300_v16  ;;  %1065 = vrcp.f32 %v668_v23 }
 0x214   : > { %725 = vst [vmem:[%s1478_s21 + $0x20] sm:$0xff] %v709_v29 }
 0x215   : > { %v1048_v3 = vpop.eup %1047  ;;  %726 = vst [vmem:[%s1478_s21 + $0x28] sm:$0xff] %v710_v17 }
 0x216   : > { %v1050_v18 = vpop.eup %1049  ;;  %v711_v4 = vmul.f32 %v1048_v3, %v1308_v20 }
 0x217   : > { %v1052_v37 = vpop.eup %1051  ;;  %v712_v39 = vmul.f32 %v1050_v18, %v1310_v21 }
 0x218   : > { %v1054_v15 = vpop.eup %1053  ;;  %727 = vst [vmem:[%s1478_s21 + $0x30] sm:$0xff] %v711_v4  ;;  %v671_v48 = vadd.f32 1.0, %v1052_v37 }
 0x219   : > { %v1056_v49 = vpop.eup %1055  ;;  %728 = vst [vmem:[%s1478_s21 + $0x38] sm:$0xff] %v712_v39  ;;  %v672_v14 = vadd.f32 1.0, %v1054_v15 }
 0x21a   : > { %v1058_v60 = vpop.eup %1057  ;;  %1067 = vrcp.f32 %v671_v48  ;;  %v669_v16 = vadd.f32 1.0, %v1056_v49 }
 0x21b   : > { %v1060_v52 = vpop.eup %1059  ;;  %1069 = vrcp.f32 %v672_v14  ;;  %v670_v20 = vadd.f32 1.0, %v1058_v60 }
 0x21c   : > { %v1062_v6 = vpop.eup %1061  ;;  %v713_v21 = vmul.f32 %v1060_v52, %v1316_v24  ;;  %1071 = vrcp.f32 %v669_v16 }
 0x21d   : > { %v714_v38 = vmul.f32 %v1062_v6, %v1318_v25  ;;  %1073 = vrcp.f32 %v670_v20 }
 0x21e   : > { %729 = vst [vmem:[%s1478_s21 + $0x40] sm:$0xff] %v713_v21 }
 0x21f   : > { %v1064_v46 = vpop.eup %1063  ;;  %730 = vst [vmem:[%s1478_s21 + $0x48] sm:$0xff] %v714_v38 }
 0x220   : > { %v1066_v7 = vpop.eup %1065  ;;  %v715_v55 = vmul.f32 %v1064_v46, %v1320_v26 }
 0x221   : > { %v716_v10 = vmul.f32 %v1066_v7, %v1322_v27 }
 0x222   : > { %731 = vst [vmem:[%s1478_s21 + $0x50] sm:$0xff] %v715_v55 }
 0x223   : > { %732 = vst [vmem:[%s1478_s21 + $0x58] sm:$0xff] %v716_v10 }
 0x227   : > { %v1068_v24 = vpop.eup %1067 }
 0x228   : > { %v1070_v25 = vpop.eup %1069  ;;  %v719_v61 = vmul.f32 %v1068_v24, %v1332_v32 }
 0x229   : > { %v1072_v41 = vpop.eup %1071  ;;  %v720_v42 = vmul.f32 %v1070_v25, %v1334_v33 }
 0x22a   : > { %v1074_v26 = vpop.eup %1073  ;;  %735 = vst [vmem:[%s1478_s21 + $0x70] sm:$0xff] %v719_v61  ;;  %v717_v27 = vmul.f32 %v1072_v41, %v1328_v30 }
 0x22b   : > { %736 = vst [vmem:[%s1478_s21 + $0x78] sm:$0xff] %v720_v42  ;;  %v718_v32 = vmul.f32 %v1074_v26, %v1330_v31 }
 0x22c   : > { %733 = vst [vmem:[%s1478_s21 + $0x60] sm:$0xff] %v717_v27 }
 0x22d   : > { %734 = vst [vmem:[%s1478_s21 + $0x68] sm:$0xff] %v718_v32 }
 0x22e   : > { %1088 = shalt.err (!%p1085_p8)
}
 0x22f   : > { %s1089_s6 = scalar_lea.hbm %s1509_s28, 2048  ;;  %s1093_s4 = scalar_lea.hbm %s1567_s2, 4096 }
 0x230   : > { %p1090_p10 = scmp.ne.s32.totalorder %s1509_s28, %s1089_s6  ;;  %p1094_p1 = scmp.lt.s32.totalorder %s1509_s28, %s1567_s2 }
 0x231   : > { %p1095_p2 = scmp.lt.s32.totalorder %s1093_s4, %s1089_s6 }
 0x232   : > { %p1091_p13 = pnand %p1090_p10, %p1234_p9 }
 0x233   : > { %p1096_p3 = por %p1095_p2, %p1094_p1 }
 0x234   : > { %p1092_p0 = pneg %p1091_p13 }
 0x236   : > { %p1097_p4 = pnand %p1096_p3, %p1092_p0 }
 0x238   : > { %1100 = shalt.err (!%p1097_p4)
}
 0x239   : > { %s1165_s15 = smov 256   ;;  %s1166_s21 = smov 512  }
 0x23a   : > { %s1167_s20 = smov 16  }
 0x23b   : > { %928 = dma.vmem_to_hbm [thread:$0]  (%p1234_p9), %s1513_s25, 2048, %s1509_s28, %s738_s12, %s1165_s15, %s1166_s21, %s1167_s20  }
 0x23c PF: > { %s772_s26 = sand.u32 1, %s1135_s9   ;;  %p931_p5 = pnand %p872_p12, %p1241_p11 }
 0x23d   : > { %s773_s27 = scalar_lea.sflag [#allocation5], %s772_s26 }
 0x23e   : > { %p932_p6 = pneg %p931_p5 }
 0x240   : > { %1130 = dma.done.wait (%p932_p6), %s773_s27, 2048  }
 0x241   : > { %1132 = vsyncadd (%p932_p6), %s773_s27, 4294965248  ;;  %s18_s14 = sadd.s32 1, %s1155_s14   ;;  %s1572_s9 = smov %s1139_s10 }
 0x242   : > { %p15_p7 = scmp.ge.s32.totalorder %s18_s14, 4   ;;  %s1573_s10 = smov %s1143_s11 }
 0x243   : > { %s1574_s11 = smov %s1239_s23  ;;  %s1575_s12 = smov %s1151_s13 }
 0x244   : > { %s1576_s13 = smov %s1578_s17  ;;  %17 = sbr.rel (!%p15_p7) target bundleno = 6 (0x6), region = 126 }
 0x249   :  { %778 = vsyncpa [#allocation4], 1 }
 0x24a   :  { %780 = vsyncpa [#allocation4 + $0x1], 1 }
 0x24b   :  { %781 = vsyncpa [#allocation5], 1 }
 0x24c   :  { %783 = vsyncpa [#allocation5 + $0x1], 1 }

</bundles_post_ra>
